<compile_context>
chip_gen: v7x
topology: tpu7x:2x2x1
jax: 0.10.0
libtpu: 0.0.40
codegen_flags: <defaults>
</compile_context>

<pallas_src>
import jax
import jax.numpy as jnp
from jax.experimental import pallas as pl
from jax.experimental.pallas import tpu as pltpu

LANE = 128
SUBLANE = 8
NEG_INF = -1e30  # finite "minus infinity" for padded logit lanes


def _round_up(v, m):
    return ((v + m - 1) // m) * m


def make_mlp_kernel(n_hidden):
    """n_hidden = number of (hidden_size -> hidden_size) layers (= depth - 1)."""

    def kernel(*refs):
        if n_hidden > 0:
            x_ref, w0_ref, b0_ref, wh_ref, bh_ref, wl_ref, bl_ref, o_ref = refs
        else:
            x_ref, w0_ref, b0_ref, wl_ref, bl_ref, o_ref = refs
            wh_ref = bh_ref = None

        # first layer + ReLU  (f32 activations, bf16 MXU operands, f32 accumulate)
        h = x_ref[...]                                                  # (TB, IN) f32
        h = jnp.dot(h.astype(w0_ref.dtype), w0_ref[...],
                    preferred_element_type=jnp.float32) + b0_ref[...]
        h = jnp.maximum(h, 0.0)

        # hidden layers (static unroll over the stacked weights)
        for li in range(n_hidden):
            w = wh_ref[li]                                              # (H_PAD, H_PAD) bf16
            b = bh_ref[li]                                              # (1, H_PAD) f32
            h = jnp.dot(h.astype(w.dtype), w,
                        preferred_element_type=jnp.float32) + b
            h = jnp.maximum(h, 0.0)

        # last layer (no ReLU); padded lanes carry ~-1e30 from the padded bias
        logits = jnp.dot(h.astype(wl_ref.dtype), wl_ref[...],
                         preferred_element_type=jnp.float32) + bl_ref[...]

        # log_softmax over the 128 padded lanes == over the real output lanes
        m = jnp.max(logits, axis=-1, keepdims=True)
        shifted = logits - m
        lse = jnp.log(jnp.sum(jnp.exp(shifted), axis=-1, keepdims=True))
        o_ref[...] = (shifted - lse).astype(o_ref.dtype)

    return kernel


def make_params(key, input_size, depth, hidden_size, output_size):
    """PyTorch-Linear-like uniform fan-in init. Weights bf16 (stored (in, out)), biases f32."""
    sizes = [input_size] + [hidden_size] * depth + [output_size]
    ks = jax.random.split(key, 2 * (depth + 1))
    params = []
    for li in range(depth + 1):
        fan_in, fan_out = sizes[li], sizes[li + 1]
        bound = 1.0 / (fan_in ** 0.5)
        w = jax.random.uniform(ks[2 * li], (fan_in, fan_out),
                               jnp.float32, -bound, bound).astype(jnp.bfloat16)
        b = jax.random.uniform(ks[2 * li + 1], (1, fan_out),
                               jnp.float32, -bound, bound)
        params.append((w, b))
    return params


def net_forward(x, params, input_size, output_size, *, block_b=512):
    """Pallas-backed forward. Returns log-probabilities of shape (B, output_size)."""
    # NOTE: x is kept f32; converting to bf16 here would just add an un-fused wrapper op.
    x2d = x.reshape(-1, input_size).astype(jnp.float32)
    B = x2d.shape[0]

    n_layers = len(params)
    n_hidden = n_layers - 2                       # layers in the ModuleList (depth - 1)
    hidden_size = params[0][0].shape[1]
    h_pad = _round_up(hidden_size, LANE)
    out_pad = _round_up(output_size, LANE)

    # ---- lane-dense padding of all layers ------------------------------------------
    w0, b0 = params[0]
    w0p = jnp.pad(w0, ((0, 0), (0, h_pad - w0.shape[1])))
    b0p = jnp.pad(b0, ((0, 0), (0, h_pad - b0.shape[1])))

    if n_hidden > 0:
        whs, bhs = [], []
        for w, b in params[1:-1]:
            whs.append(jnp.pad(w, ((0, h_pad - w.shape[0]), (0, h_pad - w.shape[1]))))
            bhs.append(jnp.pad(b, ((0, 0), (0, h_pad - b.shape[1]))))
        wh = jnp.stack(whs)                       # (n_hidden, H_PAD, H_PAD) bf16
        bh = jnp.stack(bhs)                       # (n_hidden, 1, H_PAD)     f32

    wl, bl = params[-1]
    wlp = jnp.pad(wl, ((0, h_pad - wl.shape[0]), (0, out_pad - wl.shape[1])))
    blp = jnp.pad(bl, ((0, 0), (0, out_pad - bl.shape[1])), constant_values=NEG_INF)

    # ---- batch tiling: big tiles, but keep >=2 grid steps for v7x megacore ----------
    tb = min(_round_up(block_b, SUBLANE),
             max(SUBLANE, _round_up(-(-B // 2), SUBLANE)))   # cap at ceil(B/2)
    b_padded = _round_up(B, tb)
    if b_padded != B:
        x2d = jnp.pad(x2d, ((0, b_padded - B), (0, 0)))
    grid = (b_padded // tb,)

    weight_args = [w0p, b0p] + ([wh, bh] if n_hidden > 0 else []) + [wlp, blp]
    flat_args = [x2d] + weight_args
    weight_bytes = sum(int(a.size) * a.dtype.itemsize for a in weight_args)

    # ---- cost estimate (helps XLA schedule the surrounding pad/slice) ---------------
    flops = 2 * b_padded * (input_size * h_pad + n_hidden * h_pad * h_pad + h_pad * out_pad)
    bytes_accessed = (b_padded * input_size * 4 + weight_bytes + b_padded * out_pad * 4)
    cost = pl.CostEstimate(flops=int(flops),
                           transcendentals=int(b_padded * (out_pad + 1)),
                           bytes_accessed=int(bytes_accessed))

    # ---- per-generation VMEM cap with headroom (v7x: ~48 MiB, v5e/v6e: ~96 MiB) -----
    try:
        phys_vmem = int(pltpu.get_tpu_info().vmem_capacity_bytes)
    except Exception:
        phys_vmem = 128 * 1024 * 1024
    vmem_cap = (3 * phys_vmem) // 4

    def build(resident_weights):
        wb = dict(pipeline_mode=pl.Buffered(1)) if resident_weights else {}

        def const_spec(shape):
            return pl.BlockSpec(shape, lambda i: (0,) * len(shape), **wb)

        in_specs = [pl.BlockSpec((tb, input_size), lambda i: (i, 0))]
        in_specs += [const_spec(a.shape) for a in weight_args]
        out_spec = pl.BlockSpec((tb, out_pad), lambda i: (i, 0))

        w_mult = 1 if resident_weights else 2
        need = (w_mult * weight_bytes
                + 2 * tb * (input_size + out_pad) * 4       # pipelined x / o buffers
                + 6 * tb * max(h_pad, out_pad) * 4          # live activation slabs
                + (8 << 20))                                 # compiler scratch slack
        vmem_limit = int(min(vmem_cap, need))

        return pl.pallas_call(
            make_mlp_kernel(n_hidden),
            out_shape=jax.ShapeDtypeStruct((b_padded, out_pad), jnp.float32),
            grid=grid,
            in_specs=in_specs,
            out_specs=out_spec,
            compiler_params=pltpu.CompilerParams(
                dimension_semantics=("parallel",),
                vmem_limit_bytes=vmem_limit,
            ),
            cost_estimate=cost,
        )

    try:
        out = build(True)(*flat_args)
    except Exception:
        # Fallback if this JAX build rejects single-buffering via pl.Buffered(1).
        out = build(False)(*flat_args)

    return out[:B, :output_size]


def ref_forward(x, params, input_size):
    """Pure-JAX reference with the same bf16-weight / f32-accumulate numerics."""
    h = x.reshape(-1, input_size).astype(jnp.float32)
    n = len(params)
    for li, (w, b) in enumerate(params):
        h = jnp.dot(h.astype(w.dtype), w, preferred_element_type=jnp.float32) + b
        if li < n - 1:
            h = jnp.maximum(h, 0.0)
    return jax.nn.log_softmax(h, axis=1)


if __name__ == "__main__":
    # small shapes consistent with the module
    input_size, depth, hidden_size, output_size = 64, 3, 32, 10
    batch = 8

    key = jax.random.PRNGKey(0)
    kx, kp = jax.random.split(key)
    # input given as (batch, 8, 8); forward flattens it to (batch, 64)
    x = jax.random.normal(kx, (batch, 8, 8), jnp.float32)
    params = make_params(kp, input_size, depth, hidden_size, output_size)

    out = net_forward(x, params, input_size, output_size)
    out = jax.block_until_ready(out)

    ref = ref_forward(x, params, input_size)
    assert out.shape == (batch, output_size), f"bad shape {out.shape}"
    assert bool(jnp.all(jnp.isfinite(out))), "non-finite output"
    assert jnp.allclose(out, ref, atol=1e-3, rtol=1e-3), "mismatch vs reference"

    print("KERNEL_OK")
</pallas_src>

<mosaic_0001>
module attributes {stable_mosaic.version = 11 : i64} {
  func.func @kernel(%arg0: i32, %arg1: memref<8x64xf32, #tpu.memory_space<vmem>>, %arg2: memref<64x128xbf16, #tpu.memory_space<vmem>>, %arg3: memref<1x128xf32, #tpu.memory_space<vmem>>, %arg4: memref<2x128x128xbf16, #tpu.memory_space<vmem>>, %arg5: memref<2x1x128xf32, #tpu.memory_space<vmem>>, %arg6: memref<128x128xbf16, #tpu.memory_space<vmem>>, %arg7: memref<1x128xf32, #tpu.memory_space<vmem>>, %arg8: memref<8x128xf32, #tpu.memory_space<vmem>>) attributes {dimension_semantics = [#tpu.dimension_semantics<parallel>], iteration_bounds = array<i64: 1>, scalar_prefetch = 0 : i64, scratch_operands = 0 : i64, tpu.core_type = #tpu.core_type<tc>, window_params = [{transform_indices = @transform_0, window_bounds = array<i64: 8, 64>}, {pipeline_mode = #tpu.pipeline_mode<synchronous>, transform_indices = @transform_1, window_bounds = array<i64: 64, 128>}, {pipeline_mode = #tpu.pipeline_mode<synchronous>, transform_indices = @transform_2, window_bounds = array<i64: 1, 128>}, {pipeline_mode = #tpu.pipeline_mode<synchronous>, transform_indices = @transform_3, window_bounds = array<i64: 2, 128, 128>}, {pipeline_mode = #tpu.pipeline_mode<synchronous>, transform_indices = @transform_4, window_bounds = array<i64: 2, 1, 128>}, {pipeline_mode = #tpu.pipeline_mode<synchronous>, transform_indices = @transform_5, window_bounds = array<i64: 128, 128>}, {pipeline_mode = #tpu.pipeline_mode<synchronous>, transform_indices = @transform_6, window_bounds = array<i64: 1, 128>}, {transform_indices = @transform_7, window_bounds = array<i64: 8, 128>}]} {
    %c0 = arith.constant 0 : index
    %c0_0 = arith.constant 0 : index
    %0 = vector.load %arg1[%c0, %c0_0] : memref<8x64xf32, #tpu.memory_space<vmem>>, vector<8x64xf32>
    %1 = arith.truncf %0 : vector<8x64xf32> to vector<8x64xbf16>
    %c0_1 = arith.constant 0 : index
    %c0_2 = arith.constant 0 : index
    %2 = vector.load %arg2[%c0_1, %c0_2] : memref<64x128xbf16, #tpu.memory_space<vmem>>, vector<64x128xbf16>
    %cst = arith.constant dense<0.000000e+00> : vector<8x128xf32>
    %3 = tpu.matmul %1, %2, %cst {dimension_numbers = #tpu.dot_dimension_numbers<[1], [0], [0], [1], [0, 0, 1, 1], [], []>} : vector<8x64xbf16>, vector<64x128xbf16>, vector<8x128xf32> -> vector<8x128xf32>
    %c0_3 = arith.constant 0 : index
    %c0_4 = arith.constant 0 : index
    %4 = vector.load %arg3[%c0_3, %c0_4] : memref<1x128xf32, #tpu.memory_space<vmem>>, vector<1x128xf32>
    %5 = vector.broadcast %4 : vector<1x128xf32> to vector<8x128xf32>
    %6 = arith.addf %3, %5 : vector<8x128xf32>
    %cst_5 = arith.constant 0.000000e+00 : f32
    %7 = vector.broadcast %cst_5 : f32 to vector<8x128xf32>
    %8 = arith.maximumf %6, %7 : vector<8x128xf32>
    %c0_6 = arith.constant 0 : index
    %c0_7 = arith.constant 0 : index
    %c0_8 = arith.constant 0 : index
    %9 = vector.load %arg4[%c0_6, %c0_7, %c0_8] : memref<2x128x128xbf16, #tpu.memory_space<vmem>>, vector<1x128x128xbf16>
    %10 = vector.shape_cast %9 : vector<1x128x128xbf16> to vector<128x128xbf16>
    %c0_9 = arith.constant 0 : index
    %c0_10 = arith.constant 0 : index
    %c0_11 = arith.constant 0 : index
    %11 = vector.load %arg5[%c0_9, %c0_10, %c0_11] : memref<2x1x128xf32, #tpu.memory_space<vmem>>, vector<1x1x128xf32>
    %12 = vector.shape_cast %11 : vector<1x1x128xf32> to vector<1x128xf32>
    %13 = arith.truncf %8 : vector<8x128xf32> to vector<8x128xbf16>
    %cst_12 = arith.constant dense<0.000000e+00> : vector<8x128xf32>
    %14 = tpu.matmul %13, %10, %cst_12 {dimension_numbers = #tpu.dot_dimension_numbers<[1], [0], [0], [1], [0, 0, 1, 1], [], []>} : vector<8x128xbf16>, vector<128x128xbf16>, vector<8x128xf32> -> vector<8x128xf32>
    %15 = vector.broadcast %12 : vector<1x128xf32> to vector<8x128xf32>
    %16 = arith.addf %14, %15 : vector<8x128xf32>
    %cst_13 = arith.constant 0.000000e+00 : f32
    %17 = vector.broadcast %cst_13 : f32 to vector<8x128xf32>
    %18 = arith.maximumf %16, %17 : vector<8x128xf32>
    %c1 = arith.constant 1 : index
    %c0_14 = arith.constant 0 : index
    %c0_15 = arith.constant 0 : index
    %19 = vector.load %arg4[%c1, %c0_14, %c0_15] : memref<2x128x128xbf16, #tpu.memory_space<vmem>>, vector<1x128x128xbf16>
    %20 = vector.shape_cast %19 : vector<1x128x128xbf16> to vector<128x128xbf16>
    %c1_16 = arith.constant 1 : index
    %c0_17 = arith.constant 0 : index
    %c0_18 = arith.constant 0 : index
    %21 = vector.load %arg5[%c1_16, %c0_17, %c0_18] : memref<2x1x128xf32, #tpu.memory_space<vmem>>, vector<1x1x128xf32>
    %22 = vector.shape_cast %21 : vector<1x1x128xf32> to vector<1x128xf32>
    %23 = arith.truncf %18 : vector<8x128xf32> to vector<8x128xbf16>
    %cst_19 = arith.constant dense<0.000000e+00> : vector<8x128xf32>
    %24 = tpu.matmul %23, %20, %cst_19 {dimension_numbers = #tpu.dot_dimension_numbers<[1], [0], [0], [1], [0, 0, 1, 1], [], []>} : vector<8x128xbf16>, vector<128x128xbf16>, vector<8x128xf32> -> vector<8x128xf32>
    %25 = vector.broadcast %22 : vector<1x128xf32> to vector<8x128xf32>
    %26 = arith.addf %24, %25 : vector<8x128xf32>
    %cst_20 = arith.constant 0.000000e+00 : f32
    %27 = vector.broadcast %cst_20 : f32 to vector<8x128xf32>
    %28 = arith.maximumf %26, %27 : vector<8x128xf32>
    %29 = arith.truncf %28 : vector<8x128xf32> to vector<8x128xbf16>
    %c0_21 = arith.constant 0 : index
    %c0_22 = arith.constant 0 : index
    %30 = vector.load %arg6[%c0_21, %c0_22] : memref<128x128xbf16, #tpu.memory_space<vmem>>, vector<128x128xbf16>
    %cst_23 = arith.constant dense<0.000000e+00> : vector<8x128xf32>
    %31 = tpu.matmul %29, %30, %cst_23 {dimension_numbers = #tpu.dot_dimension_numbers<[1], [0], [0], [1], [0, 0, 1, 1], [], []>} : vector<8x128xbf16>, vector<128x128xbf16>, vector<8x128xf32> -> vector<8x128xf32>
    %c0_24 = arith.constant 0 : index
    %c0_25 = arith.constant 0 : index
    %32 = vector.load %arg7[%c0_24, %c0_25] : memref<1x128xf32, #tpu.memory_space<vmem>>, vector<1x128xf32>
    %33 = vector.broadcast %32 : vector<1x128xf32> to vector<8x128xf32>
    %34 = arith.addf %31, %33 : vector<8x128xf32>
    %cst_26 = arith.constant dense<0xFF800000> : vector<8xf32>
    %35 = vector.multi_reduction <maximumf>, %34, %cst_26 [1] : vector<8x128xf32> to vector<8xf32>
    %36 = vector.shape_cast %35 : vector<8xf32> to vector<8x1xf32>
    %37 = vector.broadcast %36 : vector<8x1xf32> to vector<8x128xf32>
    %38 = arith.subf %34, %37 : vector<8x128xf32>
    %39 = math.exp %38 : vector<8x128xf32>
    %cst_27 = arith.constant dense<0.000000e+00> : vector<8xf32>
    %40 = vector.multi_reduction <add>, %39, %cst_27 [1] : vector<8x128xf32> to vector<8xf32>
    %41 = vector.shape_cast %40 : vector<8xf32> to vector<8x1xf32>
    %42 = math.log %41 : vector<8x1xf32>
    %43 = vector.broadcast %42 : vector<8x1xf32> to vector<8x128xf32>
    %44 = arith.subf %38, %43 : vector<8x128xf32>
    %c0_28 = arith.constant 0 : index
    %c0_29 = arith.constant 0 : index
    %45 = vector.load %arg8[%c0_28, %c0_29] : memref<8x128xf32, #tpu.memory_space<vmem>>, vector<8x128xf32>
    tpu.vector_store %arg8[%c0_28, %c0_29], %44 {strides = array<i32>} : memref<8x128xf32, #tpu.memory_space<vmem>>, vector<8x128xf32>,
    return
  }
  func.func @transform_0(%arg0: i32) -> (i32, i32) {
    %c0_i32 = arith.constant 0 : i32
    %c0_i32_0 = arith.constant 0 : i32
    return %arg0, %c0_i32 : i32, i32
  }
  func.func @transform_1(%arg0: i32) -> (i32, i32) {
    %c0_i32 = arith.constant 0 : i32
    %c0_i32_0 = arith.constant 0 : i32
    %c0_i32_1 = arith.constant 0 : i32
    return %c0_i32, %c0_i32_0 : i32, i32
  }
  func.func @transform_2(%arg0: i32) -> (i32, i32) {
    %c0_i32 = arith.constant 0 : i32
    %c0_i32_0 = arith.constant 0 : i32
    %c0_i32_1 = arith.constant 0 : i32
    return %c0_i32, %c0_i32_0 : i32, i32
  }
  func.func @transform_3(%arg0: i32) -> (i32, i32, i32) {
    %c0_i32 = arith.constant 0 : i32
    %c0_i32_0 = arith.constant 0 : i32
    %c0_i32_1 = arith.constant 0 : i32
    %c0_i32_2 = arith.constant 0 : i32
    return %c0_i32, %c0_i32_0, %c0_i32_1 : i32, i32, i32
  }
  func.func @transform_4(%arg0: i32) -> (i32, i32, i32) {
    %c0_i32 = arith.constant 0 : i32
    %c0_i32_0 = arith.constant 0 : i32
    %c0_i32_1 = arith.constant 0 : i32
    %c0_i32_2 = arith.constant 0 : i32
    return %c0_i32, %c0_i32_0, %c0_i32_1 : i32, i32, i32
  }
  func.func @transform_5(%arg0: i32) -> (i32, i32) {
    %c0_i32 = arith.constant 0 : i32
    %c0_i32_0 = arith.constant 0 : i32
    %c0_i32_1 = arith.constant 0 : i32
    return %c0_i32, %c0_i32_0 : i32, i32
  }
  func.func @transform_6(%arg0: i32) -> (i32, i32) {
    %c0_i32 = arith.constant 0 : i32
    %c0_i32_0 = arith.constant 0 : i32
    %c0_i32_1 = arith.constant 0 : i32
    return %c0_i32, %c0_i32_0 : i32, i32
  }
  func.func @transform_7(%arg0: i32) -> (i32, i32) {
    %c0_i32 = arith.constant 0 : i32
    %c0_i32_0 = arith.constant 0 : i32
    return %arg0, %c0_i32 : i32, i32
  }
}

module attributes {stable_mosaic.version = 11 : i64} {
  func.func @kernel(%arg0: i32, %arg1: memref<8x64xf32, #tpu.memory_space<vmem>>, %arg2: memref<64x128xbf16, #tpu.memory_space<vmem>>, %arg3: memref<1x128xf32, #tpu.memory_space<vmem>>, %arg4: memref<2x128x128xbf16, #tpu.memory_space<vmem>>, %arg5: memref<2x1x128xf32, #tpu.memory_space<vmem>>, %arg6: memref<128x128xbf16, #tpu.memory_space<vmem>>, %arg7: memref<1x128xf32, #tpu.memory_space<vmem>>, %arg8: memref<8x128xf32, #tpu.memory_space<vmem>>) attributes {dimension_semantics = [#tpu.dimension_semantics<parallel>], iteration_bounds = array<i64: 1>, scalar_prefetch = 0 : i64, scratch_operands = 0 : i64, tpu.core_type = #tpu.core_type<tc>, window_params = [{transform_indices = @transform_0, window_bounds = array<i64: 8, 64>}, {pipeline_mode = #tpu.pipeline_mode<synchronous>, transform_indices = @transform_1, window_bounds = array<i64: 64, 128>}, {pipeline_mode = #tpu.pipeline_mode<synchronous>, transform_indices = @transform_2, window_bounds = array<i64: 1, 128>}, {pipeline_mode = #tpu.pipeline_mode<synchronous>, transform_indices = @transform_3, window_bounds = array<i64: 2, 128, 128>}, {pipeline_mode = #tpu.pipeline_mode<synchronous>, transform_indices = @transform_4, window_bounds = array<i64: 2, 1, 128>}, {pipeline_mode = #tpu.pipeline_mode<synchronous>, transform_indices = @transform_5, window_bounds = array<i64: 128, 128>}, {pipeline_mode = #tpu.pipeline_mode<synchronous>, transform_indices = @transform_6, window_bounds = array<i64: 1, 128>}, {transform_indices = @transform_7, window_bounds = array<i64: 8, 128>}]} {
    %c0 = arith.constant 0 : index
    %c0_0 = arith.constant 0 : index
    %0 = vector.load %arg1[%c0, %c0_0] : memref<8x64xf32, #tpu.memory_space<vmem>>, vector<8x64xf32>
    %1 = arith.truncf %0 : vector<8x64xf32> to vector<8x64xbf16>
    %c0_1 = arith.constant 0 : index
    %c0_2 = arith.constant 0 : index
    %2 = vector.load %arg2[%c0_1, %c0_2] : memref<64x128xbf16, #tpu.memory_space<vmem>>, vector<64x128xbf16>
    %cst = arith.constant dense<0.000000e+00> : vector<8x128xf32>
    %3 = tpu.matmul %1, %2, %cst {dimension_numbers = #tpu.dot_dimension_numbers<[1], [0], [0], [1], [0, 0, 1, 1], [], []>} : vector<8x64xbf16>, vector<64x128xbf16>, vector<8x128xf32> -> vector<8x128xf32>
    %c0_3 = arith.constant 0 : index
    %c0_4 = arith.constant 0 : index
    %4 = vector.load %arg3[%c0_3, %c0_4] : memref<1x128xf32, #tpu.memory_space<vmem>>, vector<1x128xf32>
    %5 = vector.broadcast %4 : vector<1x128xf32> to vector<8x128xf32>
    %6 = arith.addf %3, %5 : vector<8x128xf32>
    %cst_5 = arith.constant 0.000000e+00 : f32
    %7 = vector.broadcast %cst_5 : f32 to vector<8x128xf32>
    %8 = arith.maximumf %6, %7 : vector<8x128xf32>
    %c0_6 = arith.constant 0 : index
    %c0_7 = arith.constant 0 : index
    %c0_8 = arith.constant 0 : index
    %9 = vector.load %arg4[%c0_6, %c0_7, %c0_8] : memref<2x128x128xbf16, #tpu.memory_space<vmem>>, vector<1x128x128xbf16>
    %10 = vector.shape_cast %9 : vector<1x128x128xbf16> to vector<128x128xbf16>
    %c0_9 = arith.constant 0 : index
    %c0_10 = arith.constant 0 : index
    %c0_11 = arith.constant 0 : index
    %11 = vector.load %arg5[%c0_9, %c0_10, %c0_11] : memref<2x1x128xf32, #tpu.memory_space<vmem>>, vector<1x1x128xf32>
    %12 = vector.shape_cast %11 : vector<1x1x128xf32> to vector<1x128xf32>
    %13 = arith.truncf %8 : vector<8x128xf32> to vector<8x128xbf16>
    %cst_12 = arith.constant dense<0.000000e+00> : vector<8x128xf32>
    %14 = tpu.matmul %13, %10, %cst_12 {dimension_numbers = #tpu.dot_dimension_numbers<[1], [0], [0], [1], [0, 0, 1, 1], [], []>} : vector<8x128xbf16>, vector<128x128xbf16>, vector<8x128xf32> -> vector<8x128xf32>
    %15 = vector.broadcast %12 : vector<1x128xf32> to vector<8x128xf32>
    %16 = arith.addf %14, %15 : vector<8x128xf32>
    %cst_13 = arith.constant 0.000000e+00 : f32
    %17 = vector.broadcast %cst_13 : f32 to vector<8x128xf32>
    %18 = arith.maximumf %16, %17 : vector<8x128xf32>
    %c1 = arith.constant 1 : index
    %c0_14 = arith.constant 0 : index
    %c0_15 = arith.constant 0 : index
    %19 = vector.load %arg4[%c1, %c0_14, %c0_15] : memref<2x128x128xbf16, #tpu.memory_space<vmem>>, vector<1x128x128xbf16>
    %20 = vector.shape_cast %19 : vector<1x128x128xbf16> to vector<128x128xbf16>
    %c1_16 = arith.constant 1 : index
    %c0_17 = arith.constant 0 : index
    %c0_18 = arith.constant 0 : index
    %21 = vector.load %arg5[%c1_16, %c0_17, %c0_18] : memref<2x1x128xf32, #tpu.memory_space<vmem>>, vector<1x1x128xf32>
    %22 = vector.shape_cast %21 : vector<1x1x128xf32> to vector<1x128xf32>
    %23 = arith.truncf %18 : vector<8x128xf32> to vector<8x128xbf16>
    %cst_19 = arith.constant dense<0.000000e+00> : vector<8x128xf32>
    %24 = tpu.matmul %23, %20, %cst_19 {dimension_numbers = #tpu.dot_dimension_numbers<[1], [0], [0], [1], [0, 0, 1, 1], [], []>} : vector<8x128xbf16>, vector<128x128xbf16>, vector<8x128xf32> -> vector<8x128xf32>
    %25 = vector.broadcast %22 : vector<1x128xf32> to vector<8x128xf32>
    %26 = arith.addf %24, %25 : vector<8x128xf32>
    %cst_20 = arith.constant 0.000000e+00 : f32
    %27 = vector.broadcast %cst_20 : f32 to vector<8x128xf32>
    %28 = arith.maximumf %26, %27 : vector<8x128xf32>
    %29 = arith.truncf %28 : vector<8x128xf32> to vector<8x128xbf16>
    %c0_21 = arith.constant 0 : index
    %c0_22 = arith.constant 0 : index
    %30 = vector.load %arg6[%c0_21, %c0_22] : memref<128x128xbf16, #tpu.memory_space<vmem>>, vector<128x128xbf16>
    %cst_23 = arith.constant dense<0.000000e+00> : vector<8x128xf32>
    %31 = tpu.matmul %29, %30, %cst_23 {dimension_numbers = #tpu.dot_dimension_numbers<[1], [0], [0], [1], [0, 0, 1, 1], [], []>} : vector<8x128xbf16>, vector<128x128xbf16>, vector<8x128xf32> -> vector<8x128xf32>
    %c0_24 = arith.constant 0 : index
    %c0_25 = arith.constant 0 : index
    %32 = vector.load %arg7[%c0_24, %c0_25] : memref<1x128xf32, #tpu.memory_space<vmem>>, vector<1x128xf32>
    %33 = vector.broadcast %32 : vector<1x128xf32> to vector<8x128xf32>
    %34 = arith.addf %31, %33 : vector<8x128xf32>
    %cst_26 = arith.constant dense<0xFF800000> : vector<8xf32>
    %35 = vector.multi_reduction <maximumf>, %34, %cst_26 [1] : vector<8x128xf32> to vector<8xf32>
    %36 = vector.shape_cast %35 : vector<8xf32> to vector<8x1xf32>
    %37 = vector.broadcast %36 : vector<8x1xf32> to vector<8x128xf32>
    %38 = arith.subf %34, %37 : vector<8x128xf32>
    %39 = math.exp %38 : vector<8x128xf32>
    %cst_27 = arith.constant dense<0.000000e+00> : vector<8xf32>
    %40 = vector.multi_reduction <add>, %39, %cst_27 [1] : vector<8x128xf32> to vector<8xf32>
    %41 = vector.shape_cast %40 : vector<8xf32> to vector<8x1xf32>
    %42 = math.log %41 : vector<8x1xf32>
    %43 = vector.broadcast %42 : vector<8x1xf32> to vector<8x128xf32>
    %44 = arith.subf %38, %43 : vector<8x128xf32>
    %c0_28 = arith.constant 0 : index
    %c0_29 = arith.constant 0 : index
    %45 = vector.load %arg8[%c0_28, %c0_29] : memref<8x128xf32, #tpu.memory_space<vmem>>, vector<8x128xf32>
    tpu.vector_store %arg8[%c0_28, %c0_29], %44 {strides = array<i32>} : memref<8x128xf32, #tpu.memory_space<vmem>>, vector<8x128xf32>,
    return
  }
  func.func @transform_0(%arg0: i32) -> (i32, i32) {
    %c0_i32 = arith.constant 0 : i32
    %c0_i32_0 = arith.constant 0 : i32
    return %arg0, %c0_i32 : i32, i32
  }
  func.func @transform_1(%arg0: i32) -> (i32, i32) {
    %c0_i32 = arith.constant 0 : i32
    %c0_i32_0 = arith.constant 0 : i32
    %c0_i32_1 = arith.constant 0 : i32
    return %c0_i32, %c0_i32_0 : i32, i32
  }
  func.func @transform_2(%arg0: i32) -> (i32, i32) {
    %c0_i32 = arith.constant 0 : i32
    %c0_i32_0 = arith.constant 0 : i32
    %c0_i32_1 = arith.constant 0 : i32
    return %c0_i32, %c0_i32_0 : i32, i32
  }
  func.func @transform_3(%arg0: i32) -> (i32, i32, i32) {
    %c0_i32 = arith.constant 0 : i32
    %c0_i32_0 = arith.constant 0 : i32
    %c0_i32_1 = arith.constant 0 : i32
    %c0_i32_2 = arith.constant 0 : i32
    return %c0_i32, %c0_i32_0, %c0_i32_1 : i32, i32, i32
  }
  func.func @transform_4(%arg0: i32) -> (i32, i32, i32) {
    %c0_i32 = arith.constant 0 : i32
    %c0_i32_0 = arith.constant 0 : i32
    %c0_i32_1 = arith.constant 0 : i32
    %c0_i32_2 = arith.constant 0 : i32
    return %c0_i32, %c0_i32_0, %c0_i32_1 : i32, i32, i32
  }
  func.func @transform_5(%arg0: i32) -> (i32, i32) {
    %c0_i32 = arith.constant 0 : i32
    %c0_i32_0 = arith.constant 0 : i32
    %c0_i32_1 = arith.constant 0 : i32
    return %c0_i32, %c0_i32_0 : i32, i32
  }
  func.func @transform_6(%arg0: i32) -> (i32, i32) {
    %c0_i32 = arith.constant 0 : i32
    %c0_i32_0 = arith.constant 0 : i32
    %c0_i32_1 = arith.constant 0 : i32
    return %c0_i32, %c0_i32_0 : i32, i32
  }
  func.func @transform_7(%arg0: i32) -> (i32, i32) {
    %c0_i32 = arith.constant 0 : i32
    %c0_i32_0 = arith.constant 0 : i32
    return %arg0, %c0_i32 : i32, i32
  }
}

</mosaic_0001>

<bundles_post_ra>
// kernel: tpu_custom_call.1
= control target key start
LH: loop header
LB: loop body
LE: loop exit
PB: predicated region body
PF: predicated region fallthrough
CT: control target
= control target key end

     0   :  { %12 = vsyncpa [#allocation3], 0  ;;  %s998_s0 = inlined_call_operand.hbm [shape: f32[8,64], index: 0, kind: input, shape index: {}]   ;;  %s999_s1 = inlined_call_operand.hbm [shape: bf16[64,128], index: 1, kind: input, shape index: {}]   ;;  %s1000_s2 = inlined_call_operand.vmem [shape: f32[1,128], index: 2, kind: input, shape index: {}]   ;;  %s1001_s3 = inlined_call_operand.hbm [shape: bf16[2,128,128], index: 3, kind: input, shape index: {}]   ;;  %s1002_s4 = inlined_call_operand.vmem [shape: f32[2,1,128], index: 4, kind: input, shape index: {}]   ;;  %s1003_s5 = inlined_call_operand.hbm [shape: bf16[128,128], index: 5, kind: input, shape index: {}]   ;;  %s1004_s6 = inlined_call_operand.vmem [shape: f32[1,128], index: 6, kind: input, shape index: {}]   ;;  %s1005_s7 = inlined_call_operand.hbm [shape: f32[8,128], index: 7, kind: output, shape index: {}]  }
   0x1   :  { %13 = vsyncpa [#allocation6], 0 }
   0x2   :  { %14 = vsyncpa [#allocation9], 0 }
   0x3   :  { %15 = vsyncpa [#allocation4], 0  ;;  %s832_s24 = smov [#allocation5]   ;;  %s714_s28 = scalar_lea.hbm %s999_s1, 512 }
   0x4   :  { %s31_s25 = sshll.u32 %s832_s24, 4  ;;  %p715_p0 = scmp.ne.s32.totalorder %s999_s1, %s714_s28  ;;  %s32_s25 = int_to_ptr.vmem [resolvable:$true] %s31_s25 }
   0x5   :  { %p718_p1 = scmp.lt.u32.totalorder %s714_s28, %s999_s1 }
   0x7   :  { %p720_p2 = pnand %p718_p1, %p715_p0 }
   0x9   :  { %723 = shalt.err (!%p720_p2)
}
   0xa   :  { %s724_s10 = scalar_lea.vmem %s32_s25, 512  ;;  %p729_p4 = scmp.lt.s32.totalorder %s32_s25, %s32_s25 }
   0xb   :  { %p725_p3 = scmp.ne.s32.totalorder %s32_s25, %s724_s10  ;;  %p730_p5 = scmp.lt.s32.totalorder %s724_s10, %s724_s10 }
   0xd   :  { %p731_p6 = por %p730_p5, %p729_p4 }
   0xf   :  { %p732_p7 = pnand %p731_p6, %p725_p3 }
  0x11   :  { %735 = shalt.err (!%p732_p7)
}
  0x12   :  { %s833_s11 = smov 64   ;;  %s834_s12 = smov 4  }
  0x13   :  { %37 = dma.hbm_to_vmem [thread:$0]  %s999_s1, 512, %s32_s25, [#allocation6], %s833_s11, %s833_s11, %s834_s12  }
  0x14   :  { %s835_s15 = smov [#allocation2]   ;;  %s836_s17 = smov [#allocation7]  }
  0x15   :  { %s22_s16 = sshll.u32 %s835_s15, 4  ;;  %s45_s18 = sshll.u32 %s836_s17, 4  ;;  %s23_s16 = int_to_ptr.vmem [resolvable:$true] %s22_s16  ;;  %s46_s18 = int_to_ptr.vmem [resolvable:$true] %s45_s18 }
  0x16   :  { %s736_s21 = scalar_lea.hbm %s998_s0, 128 }
  0x17   :  { %p737_p8 = scmp.ne.s32.totalorder %s998_s0, %s736_s21  ;;  %p740_p9 = scmp.lt.u32.totalorder %s736_s21, %s998_s0 }
  0x19   :  { %p742_p10 = pnand %p740_p9, %p737_p8 }
  0x1b   :  { %745 = shalt.err (!%p742_p10)
}
  0x1c   :  { %s746_s1 = scalar_lea.vmem %s23_s16, 128  ;;  %p751_p12 = scmp.lt.s32.totalorder %s23_s16, %s23_s16 }
  0x1d   :  { %p747_p11 = scmp.ne.s32.totalorder %s23_s16, %s746_s1  ;;  %p752_p13 = scmp.lt.s32.totalorder %s746_s1, %s746_s1 }
  0x1f   :  { %p753_p0 = por %p752_p13, %p751_p12 }
  0x21   :  { %p754_p1 = pnand %p753_p0, %p747_p11 }
  0x23   :  { %757 = shalt.err (!%p754_p1)
}
  0x24   :  { %25 = dma.hbm_to_vmem [thread:$0]  %s998_s0, 128, %s23_s16, [#allocation3]  }
  0x25   :  { %s758_s30 = scalar_lea.hbm %s1001_s3, 2048 }
  0x26   :  { %p759_p2 = scmp.ne.s32.totalorder %s1001_s3, %s758_s30  ;;  %p762_p3 = scmp.lt.u32.totalorder %s758_s30, %s1001_s3 }
  0x28   :  { %p764_p4 = pnand %p762_p3, %p759_p2 }
  0x2a   :  { %767 = shalt.err (!%p764_p4)
}
  0x2b   :  { %s768_s14 = scalar_lea.vmem %s46_s18, 2048  ;;  %p773_p6 = scmp.lt.s32.totalorder %s46_s18, %s46_s18 }
  0x2c   :  { %p769_p5 = scmp.ne.s32.totalorder %s46_s18, %s768_s14  ;;  %p774_p7 = scmp.lt.s32.totalorder %s768_s14, %s768_s14 }
  0x2e   :  { %p775_p8 = por %p774_p7, %p773_p6 }
  0x30   :  { %p776_p9 = pnand %p775_p8, %p769_p5 }
  0x32   :  { %779 = shalt.err (!%p776_p9)
}
  0x33   :  { %51 = dma.hbm_to_vmem [thread:$0]  %s1001_s3, 2048, %s46_s18, [#allocation6], %s833_s11, %s833_s11, %s834_s12  }
  0x34   :  { %s837_s16 = smov [#allocation8]   ;;  %s780_s21 = scalar_lea.hbm %s1003_s5, 1024 }
  0x35   :  { %s59_s17 = sshll.u32 %s837_s16, 4  ;;  %p781_p10 = scmp.ne.s32.totalorder %s1003_s5, %s780_s21  ;;  %s60_s17 = int_to_ptr.vmem [resolvable:$true] %s59_s17 }
  0x36   :  { %p784_p11 = scmp.lt.u32.totalorder %s780_s21, %s1003_s5 }
  0x38   :  { %p786_p12 = pnand %p784_p11, %p781_p10 }
  0x3a   :  { %789 = shalt.err (!%p786_p12)
}
  0x3b   :  { %s790_s1 = scalar_lea.vmem %s60_s17, 1024  ;;  %p795_p0 = scmp.lt.s32.totalorder %s60_s17, %s60_s17 }
  0x3c   :  { %p791_p13 = scmp.ne.s32.totalorder %s60_s17, %s790_s1  ;;  %p796_p1 = scmp.lt.s32.totalorder %s790_s1, %s790_s1 }
  0x3e   :  { %p797_p2 = por %p796_p1, %p795_p0 }
  0x40   :  { %p798_p3 = pnand %p797_p2, %p791_p13 }
  0x42   :  { %801 = shalt.err (!%p798_p3)
}
  0x43   :  { %65 = dma.hbm_to_vmem [thread:$0]  %s1003_s5, 1024, %s60_s17, [#allocation9], %s833_s11, %s833_s11, %s834_s12  }
  0x44   :  { %824 = dma.done.wait [#allocation3], 128  }
  0x45   :  { %825 = vsyncadd [#allocation3], 4294967168 }
  0x46   :  { %826 = dma.done.wait [#allocation6], 2560  }
  0x47   :  { %827 = vsyncadd [#allocation6], 4294964736 }
  0x48   :  { %828 = dma.done.wait [#allocation9], 1024  }
  0x49   :  { %829 = vsyncadd [#allocation9], 4294966272  ;;  %v838_v0 = vmov 0.0   ;;  %vm839_vm0 = vmmov 0   ;;  %v682_v1 = vld [vmem:[#allocation5] sm:$0xff]   ;;  %v683_v2 = vld [vmem:[#allocation5 + $0x8] sm:$0xff]  }
  0x4a   :  { %601 = vmatprep.subr.bf16.mxu0 %v838_v0  ;;  %609 = vmatprep.mubr.msk.bf16.mxu0 %vm839_vm0, %v838_v0  ;;  %v686_v3 = vld [vmem:[#allocation7] sm:$0xff]   ;;  %v684_v4 = vld [vmem:[#allocation5 + $0x10] sm:$0xff]   ;;  %v687_v5 = vld [vmem:[#allocation7 + $0x8] sm:$0xff]   ;;  %vm122_vm1 = vcmask 523264  }
  0x4b   :  { %613 = vmatprep.subr.bf16.mxu1 %v838_v0  ;;  %629 = vmatprep.mubr.msk.bf16.mxu1 %vm839_vm0, %v838_v0  ;;  %v685_v6 = vld [vmem:[#allocation5 + $0x18] sm:$0xff]   ;;  %v688_v8 = vld [vmem:[#allocation7 + $0x10] sm:$0xff]   ;;  %v690_v11 = vld [vmem:[#allocation7 + $0x20] sm:$0xff]  }
  0x4c   :  { %602 = vmatpush3.bf16.msra.mxu0 %v682_v1  ;;  %614 = vmatpush3.bf16.msra.mxu1 %v686_v3  ;;  %v81_v7 = vld [vmem:[#allocation2] sm:$0xff]  ;;  %v691_v12 = vld [vmem:[#allocation7 + $0x28] sm:$0xff]   ;;  %v692_v13 = vld [vmem:[#allocation7 + $0x30] sm:$0xff]  }
  0x4d   :  { %603 = vmatprep.subr.bf16.mxu0 %v838_v0  ;;  %615 = vmatprep.subr.bf16.mxu1 %v838_v0  ;;  %v82_v9 = vpack.c.bf16 %v81_v7, %v81_v7  ;;  %v689_v10 = vld [vmem:[#allocation7 + $0x18] sm:$0xff]   ;;  %v694_v15 = vld [vmem:[#allocation7 + $0x40] sm:$0xff]   ;;  %v695_v16 = vld [vmem:[#allocation7 + $0x48] sm:$0xff]  }
  0x4e   :  { %v693_v14 = vld [vmem:[#allocation7 + $0x38] sm:$0xff]   ;;  %v696_v17 = vld [vmem:[#allocation7 + $0x50] sm:$0xff]   ;;  %v698_v19 = vld [vmem:[#allocation7 + $0x60] sm:$0xff]  }
  0x4f   :  { %v697_v18 = vld [vmem:[#allocation7 + $0x58] sm:$0xff]   ;;  %v699_v20 = vld [vmem:[#allocation7 + $0x68] sm:$0xff]   ;;  %v700_v29 = vld [vmem:[#allocation7 + $0x70] sm:$0xff]  }
  0x50   :  { %604 = vmatpush3.bf16.msra.mxu0 %v683_v2  ;;  %616 = vmatpush3.bf16.msra.mxu1 %v687_v5  ;;  %v535_v21 = vld [vmem:[%s1000_s2] ss:$0 sm:$0xff]  ;;  %v702_v31 = vld [vmem:[#allocation8] sm:$0xff]   ;;  %v703_v32 = vld [vmem:[#allocation8 + $0x8] sm:$0xff]  }
  0x51   :  { %605 = vmatprep.subr.bf16.mxu0 %v838_v0  ;;  %617 = vmatprep.subr.bf16.mxu1 %v838_v0  ;;  %v701_v30 = vld [vmem:[#allocation7 + $0x78] sm:$0xff]   ;;  %v704_v33 = vld [vmem:[#allocation8 + $0x10] sm:$0xff]   ;;  %v706_v35 = vld [vmem:[#allocation8 + $0x20] sm:$0xff]  }
  0x52   :  { %v705_v34 = vld [vmem:[#allocation8 + $0x18] sm:$0xff]   ;;  %v707_v36 = vld [vmem:[#allocation8 + $0x28] sm:$0xff]   ;;  %v708_v45 = vld [vmem:[#allocation8 + $0x30] sm:$0xff]  }
  0x53   :  { %v541_v37 = vld [vmem:[%s1002_s4] ss:$0 sm:$0xff]  ;;  %v551_v47 = vld [vmem:[%s1002_s4 + $0x1] ss:$0 sm:$0xff]  ;;  %s840_s4 = smov [#allocation10]  }
  0x54   :  { %606 = vmatpush3.bf16.msra.mxu0 %v684_v4  ;;  %618 = vmatpush3.bf16.msra.mxu1 %v688_v8  ;;  %v709_v46 = vld [vmem:[#allocation8 + $0x38] sm:$0xff]   ;;  %s524_s30 = sshll.u32 %s840_s4, 4  ;;  %s525_s30 = int_to_ptr.vmem [resolvable:$true] %s524_s30 }
  0x55   :  { %607 = vmatprep.subr.bf16.mxu0 %v838_v0  ;;  %619 = vmatprep.subr.bf16.mxu1 %v838_v0  ;;  %v560_v55 = vld [vmem:[%s1004_s6] ss:$0 sm:$0xff]  ;;  %s802_s6 = scalar_lea.vmem %s525_s30, 128  ;;  %p807_p5 = scmp.lt.s32.totalorder %s525_s30, %s525_s30 }
  0x56   :  { %p803_p4 = scmp.ne.s32.totalorder %s525_s30, %s802_s6  ;;  %p808_p6 = scmp.lt.s32.totalorder %s802_s6, %s802_s6 }
  0x58   :  { %608 = vmatpush3.bf16.msra.mxu0 %v685_v6  ;;  %620 = vmatpush3.bf16.msra.mxu1 %v689_v10  ;;  %p809_p7 = por %p808_p6, %p807_p5 }
  0x59   :  { %633 = vmatprep.subr.bf16.mxu0 %v838_v0  ;;  %621 = vmatprep.subr.bf16.mxu1 %v838_v0 }
  0x5a   :  { %p810_p8 = pnand %p809_p7, %p803_p4 }
  0x5b   :  { %610 = vmatmul.mubr.msk.bf16.vlgmr.msra.gmra.mrb[0].mxu0 %vm122_vm1, %v82_v9 }
  0x5c   :  { %649 = vmatprep.mubr.msk.bf16.mxu0 %vm839_vm0, %v838_v0  ;;  %622 = vmatpush3.bf16.msra.mxu1 %v690_v11 }
  0x5d   :  { %623 = vmatprep.subr.bf16.mxu1 %v838_v0  ;;  %634 = vmatpush3.bf16.msra.mxu0 %v694_v15 }
  0x5e   :  { %635 = vmatprep.subr.bf16.mxu0 %v838_v0 }
  0x60   :  { %624 = vmatpush3.bf16.msra.mxu1 %v691_v12 }
  0x61   :  { %625 = vmatprep.subr.bf16.mxu1 %v838_v0  ;;  %636 = vmatpush3.bf16.msra.mxu0 %v695_v16 }
  0x62   :  { %637 = vmatprep.subr.bf16.mxu0 %v838_v0 }
  0x64   :  { %626 = vmatpush3.bf16.msra.mxu1 %v692_v13 }
  0x65   :  { %627 = vmatprep.subr.bf16.mxu1 %v838_v0  ;;  %638 = vmatpush3.bf16.msra.mxu0 %v696_v17 }
  0x66   :  { %639 = vmatprep.subr.bf16.mxu0 %v838_v0 }
  0x68   :  { %628 = vmatpush3.bf16.msra.mxu1 %v693_v14 }
  0x69   :  { %653 = vmatprep.subr.bf16.mxu1 %v838_v0  ;;  %640 = vmatpush3.bf16.msra.mxu0 %v697_v18 }
  0x6a   :  { %641 = vmatprep.subr.bf16.mxu0 %v838_v0 }
  0x6d   :  { %642 = vmatpush3.bf16.msra.mxu0 %v698_v19 }
  0x6e   :  { %643 = vmatprep.subr.bf16.mxu0 %v838_v0 }
  0x71   :  { %644 = vmatpush3.bf16.msra.mxu0 %v699_v20 }
  0x72   :  { %645 = vmatprep.subr.bf16.mxu0 %v838_v0 }
  0x75   :  { %646 = vmatpush3.bf16.msra.mxu0 %v700_v29 }
  0x76   :  { %647 = vmatprep.subr.bf16.mxu0 %v838_v0 }
  0x79   :  { %648 = vmatpush3.bf16.msra.mxu0 %v701_v30 }
 0x12e   :  { %v160_v22 = vpop.f32.mrb[0].mxu0 }
 0x12f   :  { %v161_v23 = vadd.f32 %v535_v21, %v160_v22  ;;  %v611_v24 = vpop.f32.mrb[1].mxu0 }
 0x130   :  { %v163_v25 = vpop.f32.mrb[2].mxu0 }
 0x131   :  { %v166_v26 = vmax.f32 %v161_v23, 0.0  ;;  %v612_v27 = vpop.f32.mrb[3].mxu0 }
 0x133   :  { %v184_v28 = vpack.c.bf16 %v166_v26, %v166_v26 }
 0x135   :  { %630 = vmatmul.mubr.bf16.vlgmr.msra.gmra.mrb[0].mxu1 %v184_v28 }
 0x136   :  { %669 = vmatprep.mubr.msk.bf16.mxu1 %vm839_vm0, %v838_v0  ;;  %654 = vmatpush3.bf16.msra.mxu1 %v702_v31 }
 0x137   :  { %655 = vmatprep.subr.bf16.mxu1 %v838_v0 }
 0x13a   :  { %656 = vmatpush3.bf16.msra.mxu1 %v703_v32 }
 0x13b   :  { %657 = vmatprep.subr.bf16.mxu1 %v838_v0 }
 0x13e   :  { %658 = vmatpush3.bf16.msra.mxu1 %v704_v33 }
 0x13f   :  { %659 = vmatprep.subr.bf16.mxu1 %v838_v0 }
 0x142   :  { %660 = vmatpush3.bf16.msra.mxu1 %v705_v34 }
 0x143   :  { %661 = vmatprep.subr.bf16.mxu1 %v838_v0 }
 0x146   :  { %662 = vmatpush3.bf16.msra.mxu1 %v706_v35 }
 0x147   :  { %663 = vmatprep.subr.bf16.mxu1 %v838_v0 }
 0x14a   :  { %664 = vmatpush3.bf16.msra.mxu1 %v707_v36 }
 0x14b   :  { %665 = vmatprep.subr.bf16.mxu1 %v838_v0 }
 0x14e   :  { %666 = vmatpush3.bf16.msra.mxu1 %v708_v45 }
 0x14f   :  { %667 = vmatprep.subr.bf16.mxu1 %v838_v0 }
 0x152   :  { %668 = vmatpush3.bf16.msra.mxu1 %v709_v46 }
 0x208   :  { %v273_v38 = vpop.f32.mrb[0].mxu1 }
 0x209   :  { %v274_v39 = vadd.f32 %v541_v37, %v273_v38  ;;  %v631_v40 = vpop.f32.mrb[1].mxu1 }
 0x20a   :  { %v276_v41 = vpop.f32.mrb[2].mxu1 }
 0x20b   :  { %v279_v42 = vmax.f32 %v274_v39, 0.0  ;;  %v632_v43 = vpop.f32.mrb[3].mxu1 }
 0x20d   :  { %v299_v44 = vpack.c.bf16 %v279_v42, %v279_v42 }
 0x20f   :  { %650 = vmatmul.mubr.bf16.vlgmr.msra.gmra.mrb[4].mxu0 %v299_v44 }
 0x2e2   :  { %v388_v48 = vpop.f32.mrb[4].mxu0 }
 0x2e3   :  { %v389_v49 = vadd.f32 %v551_v47, %v388_v48  ;;  %v651_v50 = vpop.f32.mrb[5].mxu0 }
 0x2e4   :  { %v391_v51 = vpop.f32.mrb[6].mxu0 }
 0x2e5   :  { %v394_v52 = vmax.f32 %v389_v49, 0.0  ;;  %v652_v53 = vpop.f32.mrb[7].mxu0 }
 0x2e7   :  { %v395_v54 = vpack.c.bf16 %v394_v52, %v394_v52 }
 0x2e9   :  { %670 = vmatmul.mubr.bf16.vlgmr.msra.gmra.mrb[4].mxu1 %v395_v54 }
 0x3bc   :  { %v501_v56 = vpop.f32.mrb[4].mxu1 }
 0x3bd   :  { %v502_v57 = vadd.f32 %v560_v55, %v501_v56  ;;  %v671_v58 = vpop.f32.mrb[5].mxu1 }
 0x3be   :  { %v504_v59 = vpop.f32.mrb[6].mxu1 }
 0x3bf   :  { %507 = vmax.xlane.f32.xlu0 %v502_v57  ;;  %v672_v60 = vpop.f32.mrb[7].mxu1 }
 0x44c   :  { %v508_v61 = vpop.xlane.xlu0 %507 }
 0x44d   :  { %v509_v62 = vsub.f32 %v502_v57, %v508_v61 }
 0x44f   :  { %v510_v63 = vmul.f32 1.442695, %v509_v62 }
 0x451   :  { %710 = vpow2.f32 %v510_v63 }
 0x45b   :  { %v711_v0 = vpop.eup %710 }
 0x45c   :  { %512 = vadd.xlane.f32.xlu0 %v711_v0 }
 0x4e9   :  { %v513_v1 = vpop.xlane.xlu0 %512 }
 0x4ea   :  { %712 = vlog2.f32 %v513_v1 }
 0x4f4   :  { %v713_v2 = vpop.eup %712 }
 0x4f5   :  { %v515_v3 = vmul.f32 0.6931472, %v713_v2 }
 0x4f7   :  { %v516_v4 = vsub.f32 %v509_v62, %v515_v3 }
 0x4f9   :  { %517 = vst [vmem:[#allocation10] sm:$0xff] %v516_v4 }
 0x4fa   :  { %813 = shalt.err (!%p810_p8)
}
 0x4fb   :  { %s814_s10 = scalar_lea.hbm %s1005_s7, 128 }
 0x4fc   :  { %p815_p9 = scmp.ne.s32.totalorder %s1005_s7, %s814_s10  ;;  %p818_p10 = scmp.lt.u32.totalorder %s814_s10, %s1005_s7 }
 0x4fe   :  { %p820_p11 = pnand %p818_p10, %p815_p9 }
 0x500   :  { %823 = shalt.err (!%p820_p11)
}
 0x501   :  { %527 = dma.vmem_to_hbm [thread:$0]  %s525_s30, 128, %s1005_s7, [#allocation4]  }
 0x502   :  { %830 = dma.done.wait [#allocation4], 128  }
 0x503   :  { %831 = vsyncadd [#allocation4], 4294967168 }
 0x504   :  { %531 = vsyncpa [#allocation3], 1 }
 0x505   :  { %532 = vsyncpa [#allocation6], 1 }
 0x506   :  { %533 = vsyncpa [#allocation9], 1 }
 0x507   :  { %534 = vsyncpa [#allocation4], 1 }

// kernel: tpu_custom_call.1
= control target key start
LH: loop header
LB: loop body
LE: loop exit
PB: predicated region body
PF: predicated region fallthrough
CT: control target
= control target key end

     0   :  { %12 = vsyncpa [#allocation3], 0  ;;  %s998_s0 = inlined_call_operand.hbm [shape: f32[8,64], index: 0, kind: input, shape index: {}]   ;;  %s999_s1 = inlined_call_operand.hbm [shape: bf16[64,128], index: 1, kind: input, shape index: {}]   ;;  %s1000_s2 = inlined_call_operand.vmem [shape: f32[1,128], index: 2, kind: input, shape index: {}]   ;;  %s1001_s3 = inlined_call_operand.hbm [shape: bf16[2,128,128], index: 3, kind: input, shape index: {}]   ;;  %s1002_s4 = inlined_call_operand.vmem [shape: f32[2,1,128], index: 4, kind: input, shape index: {}]   ;;  %s1003_s5 = inlined_call_operand.hbm [shape: bf16[128,128], index: 5, kind: input, shape index: {}]   ;;  %s1004_s6 = inlined_call_operand.vmem [shape: f32[1,128], index: 6, kind: input, shape index: {}]   ;;  %s1005_s7 = inlined_call_operand.hbm [shape: f32[8,128], index: 7, kind: output, shape index: {}]  }
   0x1   :  { %13 = vsyncpa [#allocation6], 0 }
   0x2   :  { %14 = vsyncpa [#allocation9], 0 }
   0x3   :  { %15 = vsyncpa [#allocation4], 0  ;;  %s832_s24 = smov [#allocation5]   ;;  %s714_s28 = scalar_lea.hbm %s999_s1, 512 }
   0x4   :  { %s31_s25 = sshll.u32 %s832_s24, 4  ;;  %p715_p0 = scmp.ne.s32.totalorder %s999_s1, %s714_s28  ;;  %s32_s25 = int_to_ptr.vmem [resolvable:$true] %s31_s25 }
   0x5   :  { %p718_p1 = scmp.lt.u32.totalorder %s714_s28, %s999_s1 }
   0x7   :  { %p720_p2 = pnand %p718_p1, %p715_p0 }
   0x9   :  { %723 = shalt.err (!%p720_p2)
}
   0xa   :  { %s724_s10 = scalar_lea.vmem %s32_s25, 512  ;;  %p729_p4 = scmp.lt.s32.totalorder %s32_s25, %s32_s25 }
   0xb   :  { %p725_p3 = scmp.ne.s32.totalorder %s32_s25, %s724_s10  ;;  %p730_p5 = scmp.lt.s32.totalorder %s724_s10, %s724_s10 }
   0xd   :  { %p731_p6 = por %p730_p5, %p729_p4 }
   0xf   :  { %p732_p7 = pnand %p731_p6, %p725_p3 }
  0x11   :  { %735 = shalt.err (!%p732_p7)
}
  0x12   :  { %s833_s11 = smov 64   ;;  %s834_s12 = smov 4  }
  0x13   :  { %37 = dma.hbm_to_vmem [thread:$0]  %s999_s1, 512, %s32_s25, [#allocation6], %s833_s11, %s833_s11, %s834_s12  }
  0x14   :  { %s835_s15 = smov [#allocation2]   ;;  %s836_s17 = smov [#allocation7]  }
  0x15   :  { %s22_s16 = sshll.u32 %s835_s15, 4  ;;  %s45_s18 = sshll.u32 %s836_s17, 4  ;;  %s23_s16 = int_to_ptr.vmem [resolvable:$true] %s22_s16  ;;  %s46_s18 = int_to_ptr.vmem [resolvable:$true] %s45_s18 }
  0x16   :  { %s736_s21 = scalar_lea.hbm %s998_s0, 128 }
  0x17   :  { %p737_p8 = scmp.ne.s32.totalorder %s998_s0, %s736_s21  ;;  %p740_p9 = scmp.lt.u32.totalorder %s736_s21, %s998_s0 }
  0x19   :  { %p742_p10 = pnand %p740_p9, %p737_p8 }
  0x1b   :  { %745 = shalt.err (!%p742_p10)
}
  0x1c   :  { %s746_s1 = scalar_lea.vmem %s23_s16, 128  ;;  %p751_p12 = scmp.lt.s32.totalorder %s23_s16, %s23_s16 }
  0x1d   :  { %p747_p11 = scmp.ne.s32.totalorder %s23_s16, %s746_s1  ;;  %p752_p13 = scmp.lt.s32.totalorder %s746_s1, %s746_s1 }
  0x1f   :  { %p753_p0 = por %p752_p13, %p751_p12 }
  0x21   :  { %p754_p1 = pnand %p753_p0, %p747_p11 }
  0x23   :  { %757 = shalt.err (!%p754_p1)
}
  0x24   :  { %25 = dma.hbm_to_vmem [thread:$0]  %s998_s0, 128, %s23_s16, [#allocation3]  }
  0x25   :  { %s758_s30 = scalar_lea.hbm %s1001_s3, 2048 }
  0x26   :  { %p759_p2 = scmp.ne.s32.totalorder %s1001_s3, %s758_s30  ;;  %p762_p3 = scmp.lt.u32.totalorder %s758_s30, %s1001_s3 }
  0x28   :  { %p764_p4 = pnand %p762_p3, %p759_p2 }
  0x2a   :  { %767 = shalt.err (!%p764_p4)
}
  0x2b   :  { %s768_s14 = scalar_lea.vmem %s46_s18, 2048  ;;  %p773_p6 = scmp.lt.s32.totalorder %s46_s18, %s46_s18 }
  0x2c   :  { %p769_p5 = scmp.ne.s32.totalorder %s46_s18, %s768_s14  ;;  %p774_p7 = scmp.lt.s32.totalorder %s768_s14, %s768_s14 }
  0x2e   :  { %p775_p8 = por %p774_p7, %p773_p6 }
  0x30   :  { %p776_p9 = pnand %p775_p8, %p769_p5 }
  0x32   :  { %779 = shalt.err (!%p776_p9)
}
  0x33   :  { %51 = dma.hbm_to_vmem [thread:$0]  %s1001_s3, 2048, %s46_s18, [#allocation6], %s833_s11, %s833_s11, %s834_s12  }
  0x34   :  { %s837_s16 = smov [#allocation8]   ;;  %s780_s21 = scalar_lea.hbm %s1003_s5, 1024 }
  0x35   :  { %s59_s17 = sshll.u32 %s837_s16, 4  ;;  %p781_p10 = scmp.ne.s32.totalorder %s1003_s5, %s780_s21  ;;  %s60_s17 = int_to_ptr.vmem [resolvable:$true] %s59_s17 }
  0x36   :  { %p784_p11 = scmp.lt.u32.totalorder %s780_s21, %s1003_s5 }
  0x38   :  { %p786_p12 = pnand %p784_p11, %p781_p10 }
  0x3a   :  { %789 = shalt.err (!%p786_p12)
}
  0x3b   :  { %s790_s1 = scalar_lea.vmem %s60_s17, 1024  ;;  %p795_p0 = scmp.lt.s32.totalorder %s60_s17, %s60_s17 }
  0x3c   :  { %p791_p13 = scmp.ne.s32.totalorder %s60_s17, %s790_s1  ;;  %p796_p1 = scmp.lt.s32.totalorder %s790_s1, %s790_s1 }
  0x3e   :  { %p797_p2 = por %p796_p1, %p795_p0 }
  0x40   :  { %p798_p3 = pnand %p797_p2, %p791_p13 }
  0x42   :  { %801 = shalt.err (!%p798_p3)
}
  0x43   :  { %65 = dma.hbm_to_vmem [thread:$0]  %s1003_s5, 1024, %s60_s17, [#allocation9], %s833_s11, %s833_s11, %s834_s12  }
  0x44   :  { %824 = dma.done.wait [#allocation3], 128  }
  0x45   :  { %825 = vsyncadd [#allocation3], 4294967168 }
  0x46   :  { %826 = dma.done.wait [#allocation6], 2560  }
  0x47   :  { %827 = vsyncadd [#allocation6], 4294964736 }
  0x48   :  { %828 = dma.done.wait [#allocation9], 1024  }
  0x49   :  { %829 = vsyncadd [#allocation9], 4294966272  ;;  %v838_v0 = vmov 0.0   ;;  %vm839_vm0 = vmmov 0   ;;  %v682_v1 = vld [vmem:[#allocation5] sm:$0xff]   ;;  %v683_v2 = vld [vmem:[#allocation5 + $0x8] sm:$0xff]  }
  0x4a   :  { %601 = vmatprep.subr.bf16.mxu0 %v838_v0  ;;  %609 = vmatprep.mubr.msk.bf16.mxu0 %vm839_vm0, %v838_v0  ;;  %v686_v3 = vld [vmem:[#allocation7] sm:$0xff]   ;;  %v684_v4 = vld [vmem:[#allocation5 + $0x10] sm:$0xff]   ;;  %v687_v5 = vld [vmem:[#allocation7 + $0x8] sm:$0xff]   ;;  %vm122_vm1 = vcmask 523264  }
  0x4b   :  { %613 = vmatprep.subr.bf16.mxu1 %v838_v0  ;;  %629 = vmatprep.mubr.msk.bf16.mxu1 %vm839_vm0, %v838_v0  ;;  %v685_v6 = vld [vmem:[#allocation5 + $0x18] sm:$0xff]   ;;  %v688_v8 = vld [vmem:[#allocation7 + $0x10] sm:$0xff]   ;;  %v690_v11 = vld [vmem:[#allocation7 + $0x20] sm:$0xff]  }
  0x4c   :  { %602 = vmatpush3.bf16.msra.mxu0 %v682_v1  ;;  %614 = vmatpush3.bf16.msra.mxu1 %v686_v3  ;;  %v81_v7 = vld [vmem:[#allocation2] sm:$0xff]  ;;  %v691_v12 = vld [vmem:[#allocation7 + $0x28] sm:$0xff]   ;;  %v692_v13 = vld [vmem:[#allocation7 + $0x30] sm:$0xff]  }
  0x4d   :  { %603 = vmatprep.subr.bf16.mxu0 %v838_v0  ;;  %615 = vmatprep.subr.bf16.mxu1 %v838_v0  ;;  %v82_v9 = vpack.c.bf16 %v81_v7, %v81_v7  ;;  %v689_v10 = vld [vmem:[#allocation7 + $0x18] sm:$0xff]   ;;  %v694_v15 = vld [vmem:[#allocation7 + $0x40] sm:$0xff]   ;;  %v695_v16 = vld [vmem:[#allocation7 + $0x48] sm:$0xff]  }
  0x4e   :  { %v693_v14 = vld [vmem:[#allocation7 + $0x38] sm:$0xff]   ;;  %v696_v17 = vld [vmem:[#allocation7 + $0x50] sm:$0xff]   ;;  %v698_v19 = vld [vmem:[#allocation7 + $0x60] sm:$0xff]  }
  0x4f   :  { %v697_v18 = vld [vmem:[#allocation7 + $0x58] sm:$0xff]   ;;  %v699_v20 = vld [vmem:[#allocation7 + $0x68] sm:$0xff]   ;;  %v700_v29 = vld [vmem:[#allocation7 + $0x70] sm:$0xff]  }
  0x50   :  { %604 = vmatpush3.bf16.msra.mxu0 %v683_v2  ;;  %616 = vmatpush3.bf16.msra.mxu1 %v687_v5  ;;  %v535_v21 = vld [vmem:[%s1000_s2] ss:$0 sm:$0xff]  ;;  %v702_v31 = vld [vmem:[#allocation8] sm:$0xff]   ;;  %v703_v32 = vld [vmem:[#allocation8 + $0x8] sm:$0xff]  }
  0x51   :  { %605 = vmatprep.subr.bf16.mxu0 %v838_v0  ;;  %617 = vmatprep.subr.bf16.mxu1 %v838_v0  ;;  %v701_v30 = vld [vmem:[#allocation7 + $0x78] sm:$0xff]   ;;  %v704_v33 = vld [vmem:[#allocation8 + $0x10] sm:$0xff]   ;;  %v706_v35 = vld [vmem:[#allocation8 + $0x20] sm:$0xff]  }
  0x52   :  { %v705_v34 = vld [vmem:[#allocation8 + $0x18] sm:$0xff]   ;;  %v707_v36 = vld [vmem:[#allocation8 + $0x28] sm:$0xff]   ;;  %v708_v45 = vld [vmem:[#allocation8 + $0x30] sm:$0xff]  }
  0x53   :  { %v541_v37 = vld [vmem:[%s1002_s4] ss:$0 sm:$0xff]  ;;  %v551_v47 = vld [vmem:[%s1002_s4 + $0x1] ss:$0 sm:$0xff]  ;;  %s840_s4 = smov [#allocation10]  }
  0x54   :  { %606 = vmatpush3.bf16.msra.mxu0 %v684_v4  ;;  %618 = vmatpush3.bf16.msra.mxu1 %v688_v8  ;;  %v709_v46 = vld [vmem:[#allocation8 + $0x38] sm:$0xff]   ;;  %s524_s30 = sshll.u32 %s840_s4, 4  ;;  %s525_s30 = int_to_ptr.vmem [resolvable:$true] %s524_s30 }
  0x55   :  { %607 = vmatprep.subr.bf16.mxu0 %v838_v0  ;;  %619 = vmatprep.subr.bf16.mxu1 %v838_v0  ;;  %v560_v55 = vld [vmem:[%s1004_s6] ss:$0 sm:$0xff]  ;;  %s802_s6 = scalar_lea.vmem %s525_s30, 128  ;;  %p807_p5 = scmp.lt.s32.totalorder %s525_s30, %s525_s30 }
  0x56   :  { %p803_p4 = scmp.ne.s32.totalorder %s525_s30, %s802_s6  ;;  %p808_p6 = scmp.lt.s32.totalorder %s802_s6, %s802_s6 }
  0x58   :  { %608 = vmatpush3.bf16.msra.mxu0 %v685_v6  ;;  %620 = vmatpush3.bf16.msra.mxu1 %v689_v10  ;;  %p809_p7 = por %p808_p6, %p807_p5 }
  0x59   :  { %633 = vmatprep.subr.bf16.mxu0 %v838_v0  ;;  %621 = vmatprep.subr.bf16.mxu1 %v838_v0 }
  0x5a   :  { %p810_p8 = pnand %p809_p7, %p803_p4 }
  0x5b   :  { %610 = vmatmul.mubr.msk.bf16.vlgmr.msra.gmra.mrb[0].mxu0 %vm122_vm1, %v82_v9 }
  0x5c   :  { %649 = vmatprep.mubr.msk.bf16.mxu0 %vm839_vm0, %v838_v0  ;;  %622 = vmatpush3.bf16.msra.mxu1 %v690_v11 }
  0x5d   :  { %623 = vmatprep.subr.bf16.mxu1 %v838_v0  ;;  %634 = vmatpush3.bf16.msra.mxu0 %v694_v15 }
  0x5e   :  { %635 = vmatprep.subr.bf16.mxu0 %v838_v0 }
  0x60   :  { %624 = vmatpush3.bf16.msra.mxu1 %v691_v12 }
  0x61   :  { %625 = vmatprep.subr.bf16.mxu1 %v838_v0  ;;  %636 = vmatpush3.bf16.msra.mxu0 %v695_v16 }
  0x62   :  { %637 = vmatprep.subr.bf16.mxu0 %v838_v0 }
  0x64   :  { %626 = vmatpush3.bf16.msra.mxu1 %v692_v13 }
  0x65   :  { %627 = vmatprep.subr.bf16.mxu1 %v838_v0  ;;  %638 = vmatpush3.bf16.msra.mxu0 %v696_v17 }
  0x66   :  { %639 = vmatprep.subr.bf16.mxu0 %v838_v0 }
  0x68   :  { %628 = vmatpush3.bf16.msra.mxu1 %v693_v14 }
  0x69   :  { %653 = vmatprep.subr.bf16.mxu1 %v838_v0  ;;  %640 = vmatpush3.bf16.msra.mxu0 %v697_v18 }
  0x6a   :  { %641 = vmatprep.subr.bf16.mxu0 %v838_v0 }
  0x6d   :  { %642 = vmatpush3.bf16.msra.mxu0 %v698_v19 }
  0x6e   :  { %643 = vmatprep.subr.bf16.mxu0 %v838_v0 }
  0x71   :  { %644 = vmatpush3.bf16.msra.mxu0 %v699_v20 }
  0x72   :  { %645 = vmatprep.subr.bf16.mxu0 %v838_v0 }
  0x75   :  { %646 = vmatpush3.bf16.msra.mxu0 %v700_v29 }
  0x76   :  { %647 = vmatprep.subr.bf16.mxu0 %v838_v0 }
  0x79   :  { %648 = vmatpush3.bf16.msra.mxu0 %v701_v30 }
 0x12e   :  { %v160_v22 = vpop.f32.mrb[0].mxu0 }
 0x12f   :  { %v161_v23 = vadd.f32 %v535_v21, %v160_v22  ;;  %v611_v24 = vpop.f32.mrb[1].mxu0 }
 0x130   :  { %v163_v25 = vpop.f32.mrb[2].mxu0 }
 0x131   :  { %v166_v26 = vmax.f32 %v161_v23, 0.0  ;;  %v612_v27 = vpop.f32.mrb[3].mxu0 }
 0x133   :  { %v184_v28 = vpack.c.bf16 %v166_v26, %v166_v26 }
 0x135   :  { %630 = vmatmul.mubr.bf16.vlgmr.msra.gmra.mrb[0].mxu1 %v184_v28 }
 0x136   :  { %669 = vmatprep.mubr.msk.bf16.mxu1 %vm839_vm0, %v838_v0  ;;  %654 = vmatpush3.bf16.msra.mxu1 %v702_v31 }
 0x137   :  { %655 = vmatprep.subr.bf16.mxu1 %v838_v0 }
 0x13a   :  { %656 = vmatpush3.bf16.msra.mxu1 %v703_v32 }
 0x13b   :  { %657 = vmatprep.subr.bf16.mxu1 %v838_v0 }
 0x13e   :  { %658 = vmatpush3.bf16.msra.mxu1 %v704_v33 }
 0x13f   :  { %659 = vmatprep.subr.bf16.mxu1 %v838_v0 }
 0x142   :  { %660 = vmatpush3.bf16.msra.mxu1 %v705_v34 }
 0x143   :  { %661 = vmatprep.subr.bf16.mxu1 %v838_v0 }
 0x146   :  { %662 = vmatpush3.bf16.msra.mxu1 %v706_v35 }
 0x147   :  { %663 = vmatprep.subr.bf16.mxu1 %v838_v0 }
 0x14a   :  { %664 = vmatpush3.bf16.msra.mxu1 %v707_v36 }
 0x14b   :  { %665 = vmatprep.subr.bf16.mxu1 %v838_v0 }
 0x14e   :  { %666 = vmatpush3.bf16.msra.mxu1 %v708_v45 }
 0x14f   :  { %667 = vmatprep.subr.bf16.mxu1 %v838_v0 }
 0x152   :  { %668 = vmatpush3.bf16.msra.mxu1 %v709_v46 }
 0x208   :  { %v273_v38 = vpop.f32.mrb[0].mxu1 }
 0x209   :  { %v274_v39 = vadd.f32 %v541_v37, %v273_v38  ;;  %v631_v40 = vpop.f32.mrb[1].mxu1 }
 0x20a   :  { %v276_v41 = vpop.f32.mrb[2].mxu1 }
 0x20b   :  { %v279_v42 = vmax.f32 %v274_v39, 0.0  ;;  %v632_v43 = vpop.f32.mrb[3].mxu1 }
 0x20d   :  { %v299_v44 = vpack.c.bf16 %v279_v42, %v279_v42 }
 0x20f   :  { %650 = vmatmul.mubr.bf16.vlgmr.msra.gmra.mrb[4].mxu0 %v299_v44 }
 0x2e2   :  { %v388_v48 = vpop.f32.mrb[4].mxu0 }
 0x2e3   :  { %v389_v49 = vadd.f32 %v551_v47, %v388_v48  ;;  %v651_v50 = vpop.f32.mrb[5].mxu0 }
 0x2e4   :  { %v391_v51 = vpop.f32.mrb[6].mxu0 }
 0x2e5   :  { %v394_v52 = vmax.f32 %v389_v49, 0.0  ;;  %v652_v53 = vpop.f32.mrb[7].mxu0 }
 0x2e7   :  { %v395_v54 = vpack.c.bf16 %v394_v52, %v394_v52 }
 0x2e9   :  { %670 = vmatmul.mubr.bf16.vlgmr.msra.gmra.mrb[4].mxu1 %v395_v54 }
 0x3bc   :  { %v501_v56 = vpop.f32.mrb[4].mxu1 }
 0x3bd   :  { %v502_v57 = vadd.f32 %v560_v55, %v501_v56  ;;  %v671_v58 = vpop.f32.mrb[5].mxu1 }
 0x3be   :  { %v504_v59 = vpop.f32.mrb[6].mxu1 }
 0x3bf   :  { %507 = vmax.xlane.f32.xlu0 %v502_v57  ;;  %v672_v60 = vpop.f32.mrb[7].mxu1 }
 0x44c   :  { %v508_v61 = vpop.xlane.xlu0 %507 }
 0x44d   :  { %v509_v62 = vsub.f32 %v502_v57, %v508_v61 }
 0x44f   :  { %v510_v63 = vmul.f32 1.442695, %v509_v62 }
 0x451   :  { %710 = vpow2.f32 %v510_v63 }
 0x45b   :  { %v711_v0 = vpop.eup %710 }
 0x45c   :  { %512 = vadd.xlane.f32.xlu0 %v711_v0 }
 0x4e9   :  { %v513_v1 = vpop.xlane.xlu0 %512 }
 0x4ea   :  { %712 = vlog2.f32 %v513_v1 }
 0x4f4   :  { %v713_v2 = vpop.eup %712 }
 0x4f5   :  { %v515_v3 = vmul.f32 0.6931472, %v713_v2 }
 0x4f7   :  { %v516_v4 = vsub.f32 %v509_v62, %v515_v3 }
 0x4f9   :  { %517 = vst [vmem:[#allocation10] sm:$0xff] %v516_v4 }
 0x4fa   :  { %813 = shalt.err (!%p810_p8)
}
 0x4fb   :  { %s814_s10 = scalar_lea.hbm %s1005_s7, 128 }
 0x4fc   :  { %p815_p9 = scmp.ne.s32.totalorder %s1005_s7, %s814_s10  ;;  %p818_p10 = scmp.lt.u32.totalorder %s814_s10, %s1005_s7 }
 0x4fe   :  { %p820_p11 = pnand %p818_p10, %p815_p9 }
 0x500   :  { %823 = shalt.err (!%p820_p11)
}
 0x501   :  { %527 = dma.vmem_to_hbm [thread:$0]  %s525_s30, 128, %s1005_s7, [#allocation4]  }
 0x502   :  { %830 = dma.done.wait [#allocation4], 128  }
 0x503   :  { %831 = vsyncadd [#allocation4], 4294967168 }
 0x504   :  { %531 = vsyncpa [#allocation3], 1 }
 0x505   :  { %532 = vsyncpa [#allocation6], 1 }
 0x506   :  { %533 = vsyncpa [#allocation9], 1 }
 0x507   :  { %534 = vsyncpa [#allocation4], 1 }

</bundles_post_ra>
